<compile_context>
chip_gen: v7x
topology: tpu7x:2x2x1
jax: 0.10.0
libtpu: 0.0.40
codegen_flags: <defaults>
</compile_context>

<pallas_src>
import functools

import jax
import jax.numpy as jnp
from jax.experimental import pallas as pl
from jax.experimental.pallas import tpu as pltpu

_LANE = 128  # lane-dense shared output slab width


# ----------------------------------------------------------------------------
# Fused kernel: painter MLP + density MLP on the same row tile.
# Both last layers are zero-padded to 128 output columns (painter -> 0..31,
# density -> 32), so the two f32 results sum into one slab and a single
# unmasked 128-wide bf16 store writes it back.
# ----------------------------------------------------------------------------
def _fused_kernel(xp_ref, xd_ref,
                  w1p_ref, b1p_ref, w2p_ref, b2p_ref, w3p_ref,
                  w1d_ref, b1d_ref, w2d_ref, b2d_ref, w3d_ref,
                  b3_ref, o_ref):
    # Cast the f32 input tiles to bf16 on the VPU (hidden under the DMA).
    xp = xp_ref[...].astype(jnp.bfloat16)
    xd = xd_ref[...].astype(jnp.bfloat16)

    # Painter head (cols 0..31 of the slab).
    h = jnp.dot(xp, w1p_ref[...], preferred_element_type=jnp.float32) + b1p_ref[...]
    h = jnp.maximum(h, 0.0).astype(jnp.bfloat16)
    h = jnp.dot(h, w2p_ref[...], preferred_element_type=jnp.float32) + b2p_ref[...]
    h = jnp.maximum(h, 0.0).astype(jnp.bfloat16)
    out = jnp.dot(h, w3p_ref[...], preferred_element_type=jnp.float32)

    # Density head (col 32 of the slab; W3d is zero in all other columns).
    g = jnp.dot(xd, w1d_ref[...], preferred_element_type=jnp.float32) + b1d_ref[...]
    g = jnp.maximum(g, 0.0).astype(jnp.bfloat16)
    g = jnp.dot(g, w2d_ref[...], preferred_element_type=jnp.float32) + b2d_ref[...]
    g = jnp.maximum(g, 0.0).astype(jnp.bfloat16)
    out = out + jnp.dot(g, w3d_ref[...], preferred_element_type=jnp.float32)

    out = out + b3_ref[...]              # fused f32 bias slab (painter 0..31, density 32)
    o_ref[...] = out.astype(o_ref.dtype)  # single unmasked (tile_m, 128) bf16 store


def _pick_tile_m(M, *, max_tile=512, min_tile=128, target_steps=8):
    """Row-tile size: aim for >= target_steps grid steps (>=4 per v7x core),
    rounded up to a multiple of 128, capped so VMEM fits on every generation."""
    t = -(-M // target_steps)                  # cdiv
    t = -(-t // min_tile) * min_tile           # round up to multiple of 128
    return max(min_tile, min(max_tile, t))


def _fused_forward(xp2d, xd2d, painter_params, density_params, b3_slab, *, tile_m):
    """Run both heads on flattened (M, D) f32 inputs; returns (M, 128) bf16 slab."""
    M, Dp = xp2d.shape
    _, Dd = xd2d.shape
    w1p, b1p, w2p, b2p, w3p = painter_params
    w1d, b1d, w2d, b2d, w3d = density_params
    H = w1p.shape[1]

    n_tiles = pl.cdiv(M, tile_m)   # edge block handles M % tile_m != 0 (no jnp.pad)

    return pl.pallas_call(
        _fused_kernel,
        out_shape=jax.ShapeDtypeStruct((M, _LANE), jnp.bfloat16),
        grid_spec=pl.GridSpec(
            grid=(n_tiles,),
            in_specs=[
                pl.BlockSpec((tile_m, Dp), lambda i: (i, 0)),    # painter x (streams, f32)
                pl.BlockSpec((tile_m, Dd), lambda i: (i, 0)),    # density x (streams, f32)
                pl.BlockSpec((Dp, H), lambda i: (0, 0)),         # painter W1 (resident, bf16)
                pl.BlockSpec((1, H), lambda i: (0, 0)),          # painter b1 (f32)
                pl.BlockSpec((H, H), lambda i: (0, 0)),          # painter W2
                pl.BlockSpec((1, H), lambda i: (0, 0)),          # painter b2
                pl.BlockSpec((H, _LANE), lambda i: (0, 0)),      # painter W3 (lane-padded)
                pl.BlockSpec((Dd, H), lambda i: (0, 0)),         # density W1
                pl.BlockSpec((1, H), lambda i: (0, 0)),          # density b1
                pl.BlockSpec((H, H), lambda i: (0, 0)),          # density W2
                pl.BlockSpec((1, H), lambda i: (0, 0)),          # density b2
                pl.BlockSpec((H, _LANE), lambda i: (0, 0)),      # density W3 (lane-padded)
                pl.BlockSpec((1, _LANE), lambda i: (0, 0)),      # fused b3 slab (f32)
            ],
            out_specs=pl.BlockSpec((tile_m, _LANE), lambda i: (i, 0)),
        ),
        compiler_params=pltpu.CompilerParams(
            dimension_semantics=("parallel",),
            vmem_limit_bytes=32 * 1024 * 1024,   # safe on v5e/v6e/v7x at tile_m <= 512
        ),
    )(xp2d, xd2d, w1p, b1p, w2p, b2p, w3p, w1d, b1d, w2d, b2d, w3d, b3_slab)


# ----------------------------------------------------------------------------
# Parameter construction (deterministic, in-script).
# ----------------------------------------------------------------------------
def _init_head_params(key, in_dim, hidden, out_dim, out_col, w_dtype=jnp.bfloat16):
    k1, k2, k3, kb1, kb2, kb3 = jax.random.split(key, 6)

    def lin(kw, kb, fan_in, fan_out):
        w = jax.random.normal(kw, (fan_in, fan_out), jnp.float32) * (1.0 / jnp.sqrt(fan_in))
        b = jax.random.normal(kb, (1, fan_out), jnp.float32) * 0.01
        return w, b

    w1, b1 = lin(k1, kb1, in_dim, hidden)
    w2, b2 = lin(k2, kb2, hidden, hidden)
    w3, b3 = lin(k3, kb3, hidden, out_dim)

    # Zero-pad the last layer into this head's column range of the shared slab.
    w3_slab = jnp.zeros((hidden, _LANE), jnp.float32).at[:, out_col:out_col + out_dim].set(w3)
    b3_slab = jnp.zeros((1, _LANE), jnp.float32).at[:, out_col:out_col + out_dim].set(b3)

    params = (w1.astype(w_dtype), b1, w2.astype(w_dtype), b2, w3_slab.astype(w_dtype))
    return params, b3_slab


class PainterDensityNetPallas:
    """Pallas implementation of PainterDensityNet.

    forward(painter_in, density_in):
        painter_in: (bs, n_pts, in_painter) -> (bs, n_pts, 32)
        density_in: (bs, n_pts, in_density) -> (bs, n_pts, 1)
    """

    PAINTER_COL, PAINTER_CH = 0, 32
    DENSITY_COL, DENSITY_CH = 32, 1

    def __init__(self, in_painter=1096, in_density=584, hidden=128, seed=0,
                 max_tile_m=512):
        key = jax.random.PRNGKey(seed)
        kp, kd = jax.random.split(key)
        self.painter_params, b3p = _init_head_params(
            kp, in_painter, hidden, self.PAINTER_CH, self.PAINTER_COL)
        self.density_params, b3d = _init_head_params(
            kd, in_density, hidden, self.DENSITY_CH, self.DENSITY_COL)
        self.b3_slab = b3p + b3d          # disjoint columns -> simple sum
        self.max_tile_m = max_tile_m

    @functools.partial(jax.jit, static_argnums=0)
    def __call__(self, painter_in, density_in):
        bs, n_pts, dp = painter_in.shape
        _, _, dd = density_in.shape
        M = bs * n_pts

        tile_m = _pick_tile_m(M, max_tile=self.max_tile_m)

        slab = _fused_forward(
            painter_in.reshape(M, dp),       # stays f32; cast happens in-kernel
            density_in.reshape(M, dd),
            self.painter_params, self.density_params, self.b3_slab,
            tile_m=tile_m)

        out_p = slab[:, self.PAINTER_COL:self.PAINTER_COL + self.PAINTER_CH]
        out_d = slab[:, self.DENSITY_COL:self.DENSITY_COL + self.DENSITY_CH]
        return (out_p.astype(jnp.float32).reshape(bs, n_pts, self.PAINTER_CH),
                out_d.astype(jnp.float32).reshape(bs, n_pts, self.DENSITY_CH))


if __name__ == "__main__":
    # Small shapes consistent with the module; M = 1000 is not a multiple of the
    # chosen tile (128) -> exercises the edge-block path, and gives 8 grid steps
    # (>=4 per v7x TensorCore under dimension_semantics=("parallel",)).
    bs, n_pts = 2, 500
    in_painter, in_density = 256, 128

    key = jax.random.PRNGKey(0)
    kp_in, kd_in = jax.random.split(key)
    painter_in = jax.random.normal(kp_in, (bs, n_pts, in_painter), jnp.float32)
    density_in = jax.random.normal(kd_in, (bs, n_pts, in_density), jnp.float32)

    net = PainterDensityNetPallas(in_painter=in_painter, in_density=in_density)

    out_painter, out_density = net(painter_in, density_in)
    jax.block_until_ready((out_painter, out_density))

    assert out_painter.shape == (bs, n_pts, 32)
    assert out_density.shape == (bs, n_pts, 1)

    # Pure-JAX reference mirroring the kernel's dtype path
    # (bf16 activations/weights, f32 MXU accumulation, bf16 output slab).
    def mlp_ref(x2d, w1, b1, w2, b2, w3_slab, b3_slab, col, ch):
        h = jnp.dot(x2d.astype(jnp.bfloat16), w1, preferred_element_type=jnp.float32) + b1
        h = jnp.maximum(h, 0.0).astype(jnp.bfloat16)
        h = jnp.dot(h, w2, preferred_element_type=jnp.float32) + b2
        h = jnp.maximum(h, 0.0).astype(jnp.bfloat16)
        o = jnp.dot(h, w3_slab, preferred_element_type=jnp.float32) + b3_slab
        return o.astype(jnp.bfloat16).astype(jnp.float32)[:, col:col + ch]

    ref_p = mlp_ref(painter_in.reshape(-1, in_painter), *net.painter_params,
                    net.b3_slab, net.PAINTER_COL, net.PAINTER_CH)
    ref_d = mlp_ref(density_in.reshape(-1, in_density), *net.density_params,
                    net.b3_slab, net.DENSITY_COL, net.DENSITY_CH)

    assert jnp.allclose(out_painter.reshape(-1, 32), ref_p, atol=1e-2, rtol=1e-2)
    assert jnp.allclose(out_density.reshape(-1, 1), ref_d, atol=1e-2, rtol=1e-2)

    print("KERNEL_OK")
</pallas_src>

<mosaic_0001>
module attributes {stable_mosaic.version = 11 : i64} {
  func.func @_fused_kernel(%arg0: i32, %arg1: memref<128x256xf32, #tpu.memory_space<vmem>>, %arg2: memref<128x128xf32, #tpu.memory_space<vmem>>, %arg3: memref<256x128xbf16, #tpu.memory_space<vmem>>, %arg4: memref<1x128xf32, #tpu.memory_space<vmem>>, %arg5: memref<128x128xbf16, #tpu.memory_space<vmem>>, %arg6: memref<1x128xf32, #tpu.memory_space<vmem>>, %arg7: memref<128x128xbf16, #tpu.memory_space<vmem>>, %arg8: memref<128x128xbf16, #tpu.memory_space<vmem>>, %arg9: memref<1x128xf32, #tpu.memory_space<vmem>>, %arg10: memref<128x128xbf16, #tpu.memory_space<vmem>>, %arg11: memref<1x128xf32, #tpu.memory_space<vmem>>, %arg12: memref<128x128xbf16, #tpu.memory_space<vmem>>, %arg13: memref<1x128xf32, #tpu.memory_space<vmem>>, %arg14: memref<128x128xbf16, #tpu.memory_space<vmem>>) attributes {dimension_semantics = [#tpu.dimension_semantics<parallel>], iteration_bounds = array<i64: 8>, scalar_prefetch = 0 : i64, scratch_operands = 0 : i64, tpu.core_type = #tpu.core_type<tc>, window_params = [{transform_indices = @transform_0, window_bounds = array<i64: 128, 256>}, {transform_indices = @transform_1, window_bounds = array<i64: 128, 128>}, {pipeline_mode = #tpu.pipeline_mode<synchronous>, transform_indices = @transform_2, window_bounds = array<i64: 256, 128>}, {pipeline_mode = #tpu.pipeline_mode<synchronous>, transform_indices = @transform_3, window_bounds = array<i64: 1, 128>}, {pipeline_mode = #tpu.pipeline_mode<synchronous>, transform_indices = @transform_4, window_bounds = array<i64: 128, 128>}, {pipeline_mode = #tpu.pipeline_mode<synchronous>, transform_indices = @transform_5, window_bounds = array<i64: 1, 128>}, {pipeline_mode = #tpu.pipeline_mode<synchronous>, transform_indices = @transform_6, window_bounds = array<i64: 128, 128>}, {pipeline_mode = #tpu.pipeline_mode<synchronous>, transform_indices = @transform_7, window_bounds = array<i64: 128, 128>}, {pipeline_mode = #tpu.pipeline_mode<synchronous>, transform_indices = @transform_8, window_bounds = array<i64: 1, 128>}, {pipeline_mode = #tpu.pipeline_mode<synchronous>, transform_indices = @transform_9, window_bounds = array<i64: 128, 128>}, {pipeline_mode = #tpu.pipeline_mode<synchronous>, transform_indices = @transform_10, window_bounds = array<i64: 1, 128>}, {pipeline_mode = #tpu.pipeline_mode<synchronous>, transform_indices = @transform_11, window_bounds = array<i64: 128, 128>}, {pipeline_mode = #tpu.pipeline_mode<synchronous>, transform_indices = @transform_12, window_bounds = array<i64: 1, 128>}, {transform_indices = @transform_13, window_bounds = array<i64: 128, 128>}]} {
    %c0 = arith.constant 0 : index
    %c0_0 = arith.constant 0 : index
    %0 = vector.load %arg1[%c0, %c0_0] : memref<128x256xf32, #tpu.memory_space<vmem>>, vector<128x256xf32>
    %1 = arith.truncf %0 : vector<128x256xf32> to vector<128x256xbf16>
    %c0_1 = arith.constant 0 : index
    %c0_2 = arith.constant 0 : index
    %2 = vector.load %arg2[%c0_1, %c0_2] : memref<128x128xf32, #tpu.memory_space<vmem>>, vector<128x128xf32>
    %3 = arith.truncf %2 : vector<128x128xf32> to vector<128x128xbf16>
    %c0_3 = arith.constant 0 : index
    %c0_4 = arith.constant 0 : index
    %4 = vector.load %arg3[%c0_3, %c0_4] : memref<256x128xbf16, #tpu.memory_space<vmem>>, vector<256x128xbf16>
    %cst = arith.constant dense<0.000000e+00> : vector<128x128xf32>
    %5 = tpu.matmul %1, %4, %cst {dimension_numbers = #tpu.dot_dimension_numbers<[1], [0], [0], [1], [0, 0, 1, 1], [], []>} : vector<128x256xbf16>, vector<256x128xbf16>, vector<128x128xf32> -> vector<128x128xf32>
    %c0_5 = arith.constant 0 : index
    %c0_6 = arith.constant 0 : index
    %6 = vector.load %arg4[%c0_5, %c0_6] : memref<1x128xf32, #tpu.memory_space<vmem>>, vector<1x128xf32>
    %7 = vector.broadcast %6 : vector<1x128xf32> to vector<128x128xf32>
    %8 = arith.addf %5, %7 : vector<128x128xf32>
    %cst_7 = arith.constant 0.000000e+00 : f32
    %9 = vector.broadcast %cst_7 : f32 to vector<128x128xf32>
    %10 = arith.maximumf %8, %9 : vector<128x128xf32>
    %11 = arith.truncf %10 : vector<128x128xf32> to vector<128x128xbf16>
    %c0_8 = arith.constant 0 : index
    %c0_9 = arith.constant 0 : index
    %12 = vector.load %arg5[%c0_8, %c0_9] : memref<128x128xbf16, #tpu.memory_space<vmem>>, vector<128x128xbf16>
    %cst_10 = arith.constant dense<0.000000e+00> : vector<128x128xf32>
    %13 = tpu.matmul %11, %12, %cst_10 {dimension_numbers = #tpu.dot_dimension_numbers<[1], [0], [0], [1], [0, 0, 1, 1], [], []>} : vector<128x128xbf16>, vector<128x128xbf16>, vector<128x128xf32> -> vector<128x128xf32>
    %c0_11 = arith.constant 0 : index
    %c0_12 = arith.constant 0 : index
    %14 = vector.load %arg6[%c0_11, %c0_12] : memref<1x128xf32, #tpu.memory_space<vmem>>, vector<1x128xf32>
    %15 = vector.broadcast %14 : vector<1x128xf32> to vector<128x128xf32>
    %16 = arith.addf %13, %15 : vector<128x128xf32>
    %cst_13 = arith.constant 0.000000e+00 : f32
    %17 = vector.broadcast %cst_13 : f32 to vector<128x128xf32>
    %18 = arith.maximumf %16, %17 : vector<128x128xf32>
    %19 = arith.truncf %18 : vector<128x128xf32> to vector<128x128xbf16>
    %c0_14 = arith.constant 0 : index
    %c0_15 = arith.constant 0 : index
    %20 = vector.load %arg7[%c0_14, %c0_15] : memref<128x128xbf16, #tpu.memory_space<vmem>>, vector<128x128xbf16>
    %cst_16 = arith.constant dense<0.000000e+00> : vector<128x128xf32>
    %21 = tpu.matmul %19, %20, %cst_16 {dimension_numbers = #tpu.dot_dimension_numbers<[1], [0], [0], [1], [0, 0, 1, 1], [], []>} : vector<128x128xbf16>, vector<128x128xbf16>, vector<128x128xf32> -> vector<128x128xf32>
    %c0_17 = arith.constant 0 : index
    %c0_18 = arith.constant 0 : index
    %22 = vector.load %arg8[%c0_17, %c0_18] : memref<128x128xbf16, #tpu.memory_space<vmem>>, vector<128x128xbf16>
    %cst_19 = arith.constant dense<0.000000e+00> : vector<128x128xf32>
    %23 = tpu.matmul %3, %22, %cst_19 {dimension_numbers = #tpu.dot_dimension_numbers<[1], [0], [0], [1], [0, 0, 1, 1], [], []>} : vector<128x128xbf16>, vector<128x128xbf16>, vector<128x128xf32> -> vector<128x128xf32>
    %c0_20 = arith.constant 0 : index
    %c0_21 = arith.constant 0 : index
    %24 = vector.load %arg9[%c0_20, %c0_21] : memref<1x128xf32, #tpu.memory_space<vmem>>, vector<1x128xf32>
    %25 = vector.broadcast %24 : vector<1x128xf32> to vector<128x128xf32>
    %26 = arith.addf %23, %25 : vector<128x128xf32>
    %cst_22 = arith.constant 0.000000e+00 : f32
    %27 = vector.broadcast %cst_22 : f32 to vector<128x128xf32>
    %28 = arith.maximumf %26, %27 : vector<128x128xf32>
    %29 = arith.truncf %28 : vector<128x128xf32> to vector<128x128xbf16>
    %c0_23 = arith.constant 0 : index
    %c0_24 = arith.constant 0 : index
    %30 = vector.load %arg10[%c0_23, %c0_24] : memref<128x128xbf16, #tpu.memory_space<vmem>>, vector<128x128xbf16>
    %cst_25 = arith.constant dense<0.000000e+00> : vector<128x128xf32>
    %31 = tpu.matmul %29, %30, %cst_25 {dimension_numbers = #tpu.dot_dimension_numbers<[1], [0], [0], [1], [0, 0, 1, 1], [], []>} : vector<128x128xbf16>, vector<128x128xbf16>, vector<128x128xf32> -> vector<128x128xf32>
    %c0_26 = arith.constant 0 : index
    %c0_27 = arith.constant 0 : index
    %32 = vector.load %arg11[%c0_26, %c0_27] : memref<1x128xf32, #tpu.memory_space<vmem>>, vector<1x128xf32>
    %33 = vector.broadcast %32 : vector<1x128xf32> to vector<128x128xf32>
    %34 = arith.addf %31, %33 : vector<128x128xf32>
    %cst_28 = arith.constant 0.000000e+00 : f32
    %35 = vector.broadcast %cst_28 : f32 to vector<128x128xf32>
    %36 = arith.maximumf %34, %35 : vector<128x128xf32>
    %37 = arith.truncf %36 : vector<128x128xf32> to vector<128x128xbf16>
    %c0_29 = arith.constant 0 : index
    %c0_30 = arith.constant 0 : index
    %38 = vector.load %arg12[%c0_29, %c0_30] : memref<128x128xbf16, #tpu.memory_space<vmem>>, vector<128x128xbf16>
    %cst_31 = arith.constant dense<0.000000e+00> : vector<128x128xf32>
    %39 = tpu.matmul %37, %38, %cst_31 {dimension_numbers = #tpu.dot_dimension_numbers<[1], [0], [0], [1], [0, 0, 1, 1], [], []>} : vector<128x128xbf16>, vector<128x128xbf16>, vector<128x128xf32> -> vector<128x128xf32>
    %40 = arith.addf %21, %39 : vector<128x128xf32>
    %c0_32 = arith.constant 0 : index
    %c0_33 = arith.constant 0 : index
    %41 = vector.load %arg13[%c0_32, %c0_33] : memref<1x128xf32, #tpu.memory_space<vmem>>, vector<1x128xf32>
    %42 = vector.broadcast %41 : vector<1x128xf32> to vector<128x128xf32>
    %43 = arith.addf %40, %42 : vector<128x128xf32>
    %44 = arith.truncf %43 : vector<128x128xf32> to vector<128x128xbf16>
    %c0_34 = arith.constant 0 : index
    %c0_35 = arith.constant 0 : index
    %45 = vector.load %arg14[%c0_34, %c0_35] : memref<128x128xbf16, #tpu.memory_space<vmem>>, vector<128x128xbf16>
    tpu.vector_store %arg14[%c0_34, %c0_35], %44 {strides = array<i32>} : memref<128x128xbf16, #tpu.memory_space<vmem>>, vector<128x128xbf16>,
    return
  }
  func.func @transform_0(%arg0: i32) -> (i32, i32) {
    %c0_i32 = arith.constant 0 : i32
    %c0_i32_0 = arith.constant 0 : i32
    return %arg0, %c0_i32 : i32, i32
  }
  func.func @transform_1(%arg0: i32) -> (i32, i32) {
    %c0_i32 = arith.constant 0 : i32
    %c0_i32_0 = arith.constant 0 : i32
    return %arg0, %c0_i32 : i32, i32
  }
  func.func @transform_2(%arg0: i32) -> (i32, i32) {
    %c0_i32 = arith.constant 0 : i32
    %c0_i32_0 = arith.constant 0 : i32
    %c0_i32_1 = arith.constant 0 : i32
    return %c0_i32, %c0_i32_0 : i32, i32
  }
  func.func @transform_3(%arg0: i32) -> (i32, i32) {
    %c0_i32 = arith.constant 0 : i32
    %c0_i32_0 = arith.constant 0 : i32
    %c0_i32_1 = arith.constant 0 : i32
    return %c0_i32, %c0_i32_0 : i32, i32
  }
  func.func @transform_4(%arg0: i32) -> (i32, i32) {
    %c0_i32 = arith.constant 0 : i32
    %c0_i32_0 = arith.constant 0 : i32
    %c0_i32_1 = arith.constant 0 : i32
    return %c0_i32, %c0_i32_0 : i32, i32
  }
  func.func @transform_5(%arg0: i32) -> (i32, i32) {
    %c0_i32 = arith.constant 0 : i32
    %c0_i32_0 = arith.constant 0 : i32
    %c0_i32_1 = arith.constant 0 : i32
    return %c0_i32, %c0_i32_0 : i32, i32
  }
  func.func @transform_6(%arg0: i32) -> (i32, i32) {
    %c0_i32 = arith.constant 0 : i32
    %c0_i32_0 = arith.constant 0 : i32
    %c0_i32_1 = arith.constant 0 : i32
    return %c0_i32, %c0_i32_0 : i32, i32
  }
  func.func @transform_7(%arg0: i32) -> (i32, i32) {
    %c0_i32 = arith.constant 0 : i32
    %c0_i32_0 = arith.constant 0 : i32
    %c0_i32_1 = arith.constant 0 : i32
    return %c0_i32, %c0_i32_0 : i32, i32
  }
  func.func @transform_8(%arg0: i32) -> (i32, i32) {
    %c0_i32 = arith.constant 0 : i32
    %c0_i32_0 = arith.constant 0 : i32
    %c0_i32_1 = arith.constant 0 : i32
    return %c0_i32, %c0_i32_0 : i32, i32
  }
  func.func @transform_9(%arg0: i32) -> (i32, i32) {
    %c0_i32 = arith.constant 0 : i32
    %c0_i32_0 = arith.constant 0 : i32
    %c0_i32_1 = arith.constant 0 : i32
    return %c0_i32, %c0_i32_0 : i32, i32
  }
  func.func @transform_10(%arg0: i32) -> (i32, i32) {
    %c0_i32 = arith.constant 0 : i32
    %c0_i32_0 = arith.constant 0 : i32
    %c0_i32_1 = arith.constant 0 : i32
    return %c0_i32, %c0_i32_0 : i32, i32
  }
  func.func @transform_11(%arg0: i32) -> (i32, i32) {
    %c0_i32 = arith.constant 0 : i32
    %c0_i32_0 = arith.constant 0 : i32
    %c0_i32_1 = arith.constant 0 : i32
    return %c0_i32, %c0_i32_0 : i32, i32
  }
  func.func @transform_12(%arg0: i32) -> (i32, i32) {
    %c0_i32 = arith.constant 0 : i32
    %c0_i32_0 = arith.constant 0 : i32
    %c0_i32_1 = arith.constant 0 : i32
    return %c0_i32, %c0_i32_0 : i32, i32
  }
  func.func @transform_13(%arg0: i32) -> (i32, i32) {
    %c0_i32 = arith.constant 0 : i32
    %c0_i32_0 = arith.constant 0 : i32
    return %arg0, %c0_i32 : i32, i32
  }
}

</mosaic_0001>

<bundles_post_ra>
// kernel: a_call__.1
= control target key start
LH: loop header
LB: loop body
LE: loop exit
PB: predicated region body
PF: predicated region fallthrough
CT: control target
= control target key end

     0   :  { %s2937_s25 = smov 0   ;;  %s2939_s26 = smov 0   ;;  %s3456_s0 = inlined_call_operand.vmem [shape: f32[1000,256], index: 0, kind: input, shape index: {}]   ;;  %s3457_s1 = inlined_call_operand.vmem [shape: f32[1000,128], index: 1, kind: input, shape index: {}]   ;;  %s3458_s2 = inlined_call_operand.vmem [shape: bf16[256,128], index: 2, kind: input, shape index: {}]   ;;  %s3459_s3 = inlined_call_operand.vmem [shape: f32[1,128], index: 3, kind: input, shape index: {}]   ;;  %s3460_s4 = inlined_call_operand.vmem [shape: bf16[128,128], index: 4, kind: input, shape index: {}]   ;;  %s3461_s5 = inlined_call_operand.vmem [shape: f32[1,128], index: 5, kind: input, shape index: {}]   ;;  %s3462_s6 = inlined_call_operand.vmem [shape: bf16[128,128], index: 6, kind: input, shape index: {}]   ;;  %s3463_s7 = inlined_call_operand.vmem [shape: bf16[128,128], index: 7, kind: input, shape index: {}]   ;;  %s3464_s8 = inlined_call_operand.vmem [shape: f32[1,128], index: 8, kind: input, shape index: {}]   ;;  %s3465_s9 = inlined_call_operand.vmem [shape: bf16[128,128], index: 9, kind: input, shape index: {}]   ;;  %s3466_s10 = inlined_call_operand.vmem [shape: f32[1,128], index: 10, kind: input, shape index: {}]   ;;  %s3467_s11 = inlined_call_operand.vmem [shape: bf16[128,128], index: 11, kind: input, shape index: {}]   ;;  %s3468_s12 = inlined_call_operand.vmem [shape: f32[1,128], index: 12, kind: input, shape index: {}]   ;;  %s3469_s13 = inlined_call_operand.vmem [shape: bf16[1000,128], index: 13, kind: output, shape index: {}]  }
   0x1   :  { %s2941_s27 = smov 0  }
   0x2 LB: > { %3471 = sst [smem:[#allocation3_spill]] %s2829_s26  ;;  %s2950_s28 = sadd.s32 4294967295, %s2833_s27   ;;  %s2833_s27 = sphi %s2941_s27, %s3479_s27   ;;  %s2829_s26 = sphi %s2939_s26, %s3478_s26   ;;  %s2825_s25 = sphi %s2937_s25, %s3477_s25  }
   0x3   : > { %s2952_s29 = sadd.s32 1, %s2833_s27   ;;  %s313_s14 = sadd.s32 1, %s2829_s26 }
   0x4   : > { %s310_s30 = ssub.s32 %s2833_s27, %s2952_s29  ;;  %p323_p1 = scmp.ne.s32.totalorder %s2829_s26, %s2825_s25 }
   0x5   : > { %p311_p0 = scmp.eq.s32.totalorder %s310_s30, 0  ;;  %p324_p2 = scmp.eq.s32.totalorder %s2950_s28, 7 }
   0x6   : > { %p2131_p3 = scmp.ge.s32.totalorder %s2833_s27, 1  ;;  %p418_p5 = scmp.lt.s32.totalorder %s2833_s27, 9 }
   0x7   : > { %s2960_s15 = scalar_select %p311_p0, %s2829_s26, %s313_s14  }
   0x8   : > { %p2962_p4 = por %p324_p2, %p323_p1  ;;  %p419_p6 = pnand %p2131_p3, %p418_p5 }
   0x9   : > { %3472 = sst [smem:[#allocation4_spill]] %s2960_s15  ;;  %v2723_v0 = vld [vmem:[%s3458_s2 + $0x40] sm:$0xff] (!%p419_p6)   ;;  %s2970_s19 = sshll.u32 (!%p419_p6), %s2950_s28, 4  ;;  %v2725_v2 = vld [vmem:[%s3458_s2 + $0x48] sm:$0xff] (!%p419_p6)   ;;  %v2727_v4 = vld [vmem:[%s3458_s2 + $0x50] sm:$0xff] (!%p419_p6)  }
   0xa   : > { %422 = sbr.rel (%p419_p6) target bundleno = 1092 (0x444), region = 72  ;;  %v2724_v1 = vld [vmem:[%s3458_s2] sm:$0xff] (!%p419_p6)   ;;  %2299 = vmatprep.subr.bf16.mxu0 (!%p419_p6), %v2723_v0  ;;  %p482_p7 = scmp.lt.s32.totalorder (!%p419_p6), %s2970_s19, 124  ;;  %v2726_v3 = vld [vmem:[%s3458_s2 + $0x8] sm:$0xff] (!%p419_p6)   ;;  %v2728_v5 = vld [vmem:[%s3458_s2 + $0x10] sm:$0xff] (!%p419_p6)  }
   0xb   : > { %2300 = vmatpush3.bf16.msra.mxu0 (!%p419_p6), %v2724_v1  ;;  %v2729_v6 = vld [vmem:[%s3458_s2 + $0x58] sm:$0xff] (!%p419_p6)   ;;  %v2731_v8 = vld [vmem:[%s3458_s2 + $0x60] sm:$0xff] (!%p419_p6)   ;;  %v2733_v10 = vld [vmem:[%s3458_s2 + $0x68] sm:$0xff] (!%p419_p6)   ;;  %s473_s26 = sand.u32 (!%p419_p6), 1, %s2825_s25  }
   0xc   : > { %2301 = vmatprep.subr.bf16.mxu0 (!%p419_p6), %v2725_v2  ;;  %v2730_v7 = vld [vmem:[%s3458_s2 + $0x18] sm:$0xff] (!%p419_p6)   ;;  %v2732_v9 = vld [vmem:[%s3458_s2 + $0x20] sm:$0xff] (!%p419_p6)   ;;  %v2734_v14 = vld [vmem:[%s3458_s2 + $0x28] sm:$0xff] (!%p419_p6)  }
   0xd   : > { %v2735_v15 = vld [vmem:[%s3458_s2 + $0x70] sm:$0xff] (!%p419_p6)   ;;  %v2737_v17 = vld [vmem:[%s3458_s2 + $0x78] sm:$0xff] (!%p419_p6)   ;;  %v2739_v23 = vld [vmem:[%s3460_s4] sm:$0xff] (!%p419_p6)  }
   0xe   : > { %v2736_v16 = vld [vmem:[%s3458_s2 + $0x30] sm:$0xff] (!%p419_p6)   ;;  %v2738_v18 = vld [vmem:[%s3458_s2 + $0x38] sm:$0xff] (!%p419_p6)   ;;  %v2740_v24 = vld [vmem:[%s3460_s4 + $0x8] sm:$0xff] (!%p419_p6)   ;;  %2443 = vmatprep.subr.bf16.mxu1 (!%p419_p6), %v2739_v23 }
   0xf   : > { %2302 = vmatpush3.bf16.msra.mxu0 (!%p419_p6), %v2726_v3  ;;  %v2741_v25 = vld [vmem:[%s3460_s4 + $0x10] sm:$0xff] (!%p419_p6)   ;;  %2444 = vmatpush3.bf16.msra.mxu1 (!%p419_p6), %v2739_v23  ;;  %v2742_v3 = vld [vmem:[%s3460_s4 + $0x18] sm:$0xff] (!%p419_p6)  }
  0x10   : > { %2303 = vmatprep.subr.bf16.mxu0 (!%p419_p6), %v2727_v4  ;;  %2445 = vmatprep.subr.bf16.mxu1 (!%p419_p6), %v2740_v24  ;;  %v2743_v4 = vld [vmem:[%s3460_s4 + $0x20] sm:$0xff] (!%p419_p6)  }
  0x11   : > { %s2986_s17 = scalar_select %p482_p7, %s2970_s19, 124 }
  0x12   : > { %s1850_s27 = ssub.s32 (%p2962_p4), 125, %s2970_s19 }
  0x13   : > { %s2232_s23 = sshll.u32 %s2986_s17, 4  ;;  %2304 = vmatpush3.bf16.msra.mxu0 %v2728_v5  ;;  %2446 = vmatpush3.bf16.msra.mxu1 %v2740_v24  ;;  %v2744_v5 = vld [vmem:[%s3460_s4 + $0x28] sm:$0xff]   ;;  %p1851_p8 = scmp.lt.s32.totalorder (%p2962_p4), %s1850_s27, 16 }
  0x14   : > { %2305 = vmatprep.subr.bf16.mxu0 %v2729_v6  ;;  %s3004_s18 = scalar_lea.vmem %s3456_s0, %s2232_s23  ;;  %2447 = vmatprep.subr.bf16.mxu1 %v2741_v25  ;;  %v2745_v6 = vld [vmem:[%s3460_s4 + $0x30] sm:$0xff]   ;;  %s2132_s23 = sshll.u32 %s473_s26, 6 }
  0x15   : > { %v514_v11 = vld [vmem:[%s3004_s18 + $0x8] sm:$0xff]  ;;  %v516_v12 = vld [vmem:[%s3004_s18 + $0x18] sm:$0xff]  ;;  %v513_v19 = vld [vmem:[%s3004_s18] sm:$0xff]  ;;  %s3343_s25 = scalar_lea.vmem [#allocation2], %s2132_s23  }
  0x16   : > { %v546_v13 = vpack.c.bf16 %v516_v12, %v514_v11  ;;  %v515_v20 = vld [vmem:[%s3004_s18 + $0x10] sm:$0xff]  ;;  %v518_v21 = vld [vmem:[%s3004_s18 + $0x28] sm:$0xff]  ;;  %v520_v22 = vld [vmem:[%s3004_s18 + $0x38] sm:$0xff] }
  0x17   : > { %2306 = vmatpush3.bf16.msra.mxu0 %v2730_v7  ;;  %v545_v26 = vpack.c.bf16 %v515_v20, %v513_v19  ;;  %v548_v27 = vpack.c.bf16 %v520_v22, %v518_v21  ;;  %v517_v28 = vld [vmem:[%s3004_s18 + $0x20] sm:$0xff]  ;;  %v519_v29 = vld [vmem:[%s3004_s18 + $0x30] sm:$0xff]  ;;  %v522_v30 = vld [vmem:[%s3004_s18 + $0x48] sm:$0xff]  ;;  %2448 = vmatpush3.bf16.msra.mxu1 %v2741_v25 }
  0x18   : > { %2307 = vmatprep.subr.bf16.mxu0 %v2731_v8  ;;  %752 = vmatprep.mubr.bf16.mxu0 %v546_v13  ;;  %v524_v31 = vld [vmem:[%s3004_s18 + $0x58] sm:$0xff]  ;;  %v547_v32 = vpack.c.bf16 %v519_v29, %v517_v28  ;;  %v521_v34 = vld [vmem:[%s3004_s18 + $0x40] sm:$0xff]  ;;  %v523_v35 = vld [vmem:[%s3004_s18 + $0x50] sm:$0xff] }
  0x19   : > { %v550_v33 = vpack.c.bf16 %v524_v31, %v522_v30  ;;  %v526_v36 = vld [vmem:[%s3004_s18 + $0x68] sm:$0xff]  ;;  %v528_v37 = vld [vmem:[%s3004_s18 + $0x78] sm:$0xff]  ;;  %v549_v38 = vpack.c.bf16 %v523_v35, %v521_v34  ;;  %v525_v40 = vld [vmem:[%s3004_s18 + $0x60] sm:$0xff]  ;;  %2449 = vmatprep.subr.bf16.mxu1 %v2742_v3 }
  0x1a   : > { %v552_v39 = vpack.c.bf16 %v528_v37, %v526_v36  ;;  %v527_v41 = vld [vmem:[%s3004_s18 + $0x70] sm:$0xff]  ;;  %v530_v42 = vld [vmem:[%s3004_s18 + $0x88] sm:$0xff]  ;;  %v532_v43 = vld [vmem:[%s3004_s18 + $0x98] sm:$0xff] }
  0x1b   : > { %2308 = vmatpush3.bf16.msra.mxu0 %v2732_v9  ;;  %v551_v44 = vpack.c.bf16 %v527_v41, %v525_v40  ;;  %v554_v45 = vpack.c.bf16 %v532_v43, %v530_v42  ;;  %v529_v46 = vld [vmem:[%s3004_s18 + $0x80] sm:$0xff]  ;;  %v531_v47 = vld [vmem:[%s3004_s18 + $0x90] sm:$0xff]  ;;  %v534_v48 = vld [vmem:[%s3004_s18 + $0xa8] sm:$0xff]  ;;  %2450 = vmatpush3.bf16.msra.mxu1 %v2742_v3 }
  0x1c   : > { %2309 = vmatprep.subr.bf16.mxu0 %v2733_v10  ;;  %v536_v49 = vld [vmem:[%s3004_s18 + $0xb8] sm:$0xff]  ;;  %v553_v50 = vpack.c.bf16 %v531_v47, %v529_v46  ;;  %v533_v52 = vld [vmem:[%s3004_s18 + $0xa0] sm:$0xff]  ;;  %v535_v53 = vld [vmem:[%s3004_s18 + $0xb0] sm:$0xff]  ;;  %2451 = vmatprep.subr.bf16.mxu1 %v2743_v4 }
  0x1d   : > { %v556_v51 = vpack.c.bf16 %v536_v49, %v534_v48  ;;  %v538_v54 = vld [vmem:[%s3004_s18 + $0xc8] sm:$0xff]  ;;  %v540_v55 = vld [vmem:[%s3004_s18 + $0xd8] sm:$0xff]  ;;  %v555_v56 = vpack.c.bf16 %v535_v53, %v533_v52  ;;  %v537_v58 = vld [vmem:[%s3004_s18 + $0xc0] sm:$0xff] }
  0x1e   : > { %v558_v57 = vpack.c.bf16 %v540_v55, %v538_v54  ;;  %v539_v59 = vld [vmem:[%s3004_s18 + $0xd0] sm:$0xff]  ;;  %v542_v60 = vld [vmem:[%s3004_s18 + $0xe8] sm:$0xff]  ;;  %v544_v61 = vld [vmem:[%s3004_s18 + $0xf8] sm:$0xff] }
  0x1f   : > { %2310 = vmatpush3.bf16.msra.mxu0 %v2734_v14  ;;  %v557_v62 = vpack.c.bf16 %v539_v59, %v537_v58  ;;  %v560_v63 = vpack.c.bf16 %v544_v61, %v542_v60  ;;  %v541_v0 = vld [vmem:[%s3004_s18 + $0xe0] sm:$0xff]  ;;  %v543_v1 = vld [vmem:[%s3004_s18 + $0xf0] sm:$0xff]  ;;  %2452 = vmatpush3.bf16.msra.mxu1 %v2743_v4  ;;  %v2746_v7 = vld [vmem:[%s3460_s4 + $0x38] sm:$0xff]   ;;  %s2137_s18 = sshll.u32 %s2986_s17, 3 }
  0x20   : > { %2311 = vmatprep.subr.bf16.mxu0 %v2735_v15  ;;  %v559_v2 = vpack.c.bf16 %v543_v1, %v541_v0  ;;  %2453 = vmatprep.subr.bf16.mxu1 %v2744_v5  ;;  %v2747_v8 = vld [vmem:[%s3463_s7] sm:$0xff]   ;;  %v2748_v36 = vld [vmem:[%s3463_s7 + $0x8] sm:$0xff]   ;;  %v2749_v41 = vld [vmem:[%s3463_s7 + $0x10] sm:$0xff]   ;;  %s3130_s30 = scalar_lea.vmem %s3457_s1, %s2137_s18 }
  0x21   : > { %v3089_v11 = vld [vmem:[%s3459_s3] ss:$0 sm:$0xff]  ;;  %v2750_v49 = vld [vmem:[%s3463_s7 + $0x18] sm:$0xff]   ;;  %v2753_v3 = vld [vmem:[%s3463_s7 + $0x30] sm:$0xff]  }
  0x22   : > { %v2751_v54 = vld [vmem:[%s3463_s7 + $0x20] sm:$0xff]  }
  0x23   : > { %2312 = vmatpush3.bf16.msra.mxu0 %v2736_v16  ;;  %2454 = vmatpush3.bf16.msra.mxu1 %v2744_v5 }
  0x24   : > { %2313 = vmatprep.subr.bf16.mxu0 %v2737_v17  ;;  %2455 = vmatprep.subr.bf16.mxu1 %v2745_v6 }
  0x27   : > { %2314 = vmatpush3.bf16.msra.mxu0 %v2738_v18  ;;  %2456 = vmatpush3.bf16.msra.mxu1 %v2745_v6 }
  0x28   : > { %2457 = vmatprep.subr.bf16.mxu1 %v2746_v7 }
  0x2a   : > { %753 = vmatmul.mubr.bf16.vlgmr.msra.gmra.mrb[0].mxu0 %v545_v26 }
  0x2b   : > { %760 = vmatprep.mubr.bf16.mxu0 %v548_v27  ;;  %2458 = vmatpush3.bf16.msra.mxu1 %v2746_v7 }
  0x2c   : > { %2475 = vmatprep.subr.bf16.mxu1 %v2747_v8 }
  0x32   : > { %761 = vmatmul.mubr.bf16.gmra.mrb[4].mxu0 %v547_v32 }
  0x33   : > { %768 = vmatprep.mubr.bf16.mxu0 %v550_v33 }
  0x3a   : > { %769 = vmatmul.mubr.bf16.gmra.mrb[8].mxu0 %v549_v38 }
  0x3b   : > { %776 = vmatprep.mubr.bf16.mxu0 %v552_v39 }
  0x42   : > { %777 = vmatmul.mubr.bf16.gmra.mrb[12].mxu0 %v551_v44 }
  0x43   : > { %784 = vmatprep.mubr.bf16.mxu0 %v554_v45 }
  0x4a   : > { %785 = vmatmul.mubr.bf16.gmra.mrb[16].mxu0 %v553_v50 }
  0x4b   : > { %792 = vmatprep.mubr.bf16.mxu0 %v556_v51 }
  0x52   : > { %793 = vmatmul.mubr.bf16.gmra.mrb[20].mxu0 %v555_v56 }
  0x53   : > { %800 = vmatprep.mubr.bf16.mxu0 %v558_v57 }
  0x5a   : > { %801 = vmatmul.mubr.bf16.gmra.mrb[24].mxu0 %v557_v62  ;;  %v2752_v62 = vld [vmem:[%s3463_s7 + $0x28] sm:$0xff]  }
  0x5b   : > { %808 = vmatprep.mubr.bf16.mxu0 %v560_v63 }
  0x62   : > { %809 = vmatmul.mubr.bf16.gmra.mrb[28].mxu0 %v559_v2 }
  0xfd   : > { %v2315_v9 = vpop.f32.mrb[0].mxu0 }
  0xfe   : > { %v2316_v10 = vpop.f32.mrb[1].mxu0 }
  0xff   : > { %v2317_v12 = vadd.f32 %v2316_v10, %v2315_v9  ;;  %v2318_v13 = vpop.f32.mrb[2].mxu0 }
 0x100   : > { %v2319_v14 = vpop.f32.mrb[3].mxu0 }
 0x101   : > { %v2320_v15 = vadd.f32 %v2319_v14, %v2318_v13  ;;  %v755_v16 = vadd.f32 %v2317_v12, %v3089_v11  ;;  %v2754_v12 = vld [vmem:[%s3463_s7 + $0x38] sm:$0xff]  }
 0x103   : > { %v758_v17 = vadd.f32 %v2320_v15, %v3089_v11  ;;  %v817_v19 = vmax.f32 %v755_v16, 0.0 }
 0x105   : > { %v2321_v18 = vpop.f32.mrb[4].mxu0  ;;  %v818_v20 = vmax.f32 %v758_v17, 0.0 }
 0x106   : > { %v2322_v21 = vpop.f32.mrb[5].mxu0 }
 0x107   : > { %v2323_v22 = vadd.f32 %v2322_v21, %v2321_v18  ;;  %v2324_v23 = vpop.f32.mrb[6].mxu0  ;;  %v833_v24 = vpack.c.bf16 %v818_v20, %v817_v19 }
 0x108   : > { %v2325_v25 = vpop.f32.mrb[7].mxu0 }
 0x109   : > { %v763_v26 = vadd.f32 %v2323_v22, %v3089_v11  ;;  %v2326_v27 = vadd.f32 %v2325_v25, %v2324_v23  ;;  %2459 = vmatprep.mubr.bf16.mxu1 %v833_v24 }
 0x10b   : > { %v766_v28 = vadd.f32 %v2326_v27, %v3089_v11  ;;  %v819_v29 = vmax.f32 %v763_v26, 0.0 }
 0x10d   : > { %v820_v30 = vmax.f32 %v766_v28, 0.0  ;;  %v2327_v31 = vpop.f32.mrb[8].mxu0 }
 0x10e   : > { %v2328_v32 = vpop.f32.mrb[9].mxu0 }
 0x10f   : > { %v2329_v33 = vadd.f32 %v2328_v32, %v2327_v31  ;;  %v2330_v34 = vpop.f32.mrb[10].mxu0  ;;  %v834_v35 = vpack.c.bf16 %v820_v30, %v819_v29 }
 0x110   : > { %v2331_v37 = vpop.f32.mrb[11].mxu0 }
 0x111   : > { %v771_v38 = vadd.f32 %v2329_v33, %v3089_v11  ;;  %v2332_v39 = vadd.f32 %v2331_v37, %v2330_v34  ;;  %2460 = vmatmul.mubr.bf16.vlgmr.msra.gmra.mrb[0].mxu1 %v834_v35 }
 0x112   : > { %2476 = vmatpush3.bf16.msra.mxu1 %v2747_v8 }
 0x113   : > { %v774_v40 = vadd.f32 %v2332_v39, %v3089_v11  ;;  %2477 = vmatprep.subr.bf16.mxu1 %v2748_v36  ;;  %v821_v42 = vmax.f32 %v771_v38, 0.0  ;;  %v561_v39 = vld [vmem:[%s3130_s30] sm:$0xff] }
 0x115   : > { %v822_v43 = vmax.f32 %v774_v40, 0.0  ;;  %v2333_v44 = vpop.f32.mrb[12].mxu0  ;;  %v562_v40 = vld [vmem:[%s3130_s30 + $0x8] sm:$0xff] }
 0x116   : > { %v2334_v45 = vpop.f32.mrb[13].mxu0  ;;  %2478 = vmatpush3.bf16.msra.mxu1 %v2748_v36 }
 0x117   : > { %v2335_v46 = vadd.f32 %v2334_v45, %v2333_v44  ;;  %v2336_v47 = vpop.f32.mrb[14].mxu0  ;;  %v835_v48 = vpack.c.bf16 %v822_v43, %v821_v42  ;;  %2479 = vmatprep.subr.bf16.mxu1 %v2749_v41  ;;  %v577_v43 = vpack.c.bf16 %v562_v40, %v561_v39  ;;  %v563_v45 = vld [vmem:[%s3130_s30 + $0x10] sm:$0xff] }
 0x118   : > { %v2337_v50 = vpop.f32.mrb[15].mxu0 }
 0x119   : > { %v779_v51 = vadd.f32 %v2335_v46, %v3089_v11  ;;  %v2338_v52 = vadd.f32 %v2337_v50, %v2336_v47  ;;  %2463 = vmatprep.mubr.bf16.mxu1 %v835_v48  ;;  %v564_v46 = vld [vmem:[%s3130_s30 + $0x18] sm:$0xff]  ;;  %v565_v47 = vld [vmem:[%s3130_s30 + $0x20] sm:$0xff]  ;;  %v566_v48 = vld [vmem:[%s3130_s30 + $0x28] sm:$0xff] }
 0x11a   : > { %2480 = vmatpush3.bf16.msra.mxu1 %v2749_v41  ;;  %v567_v50 = vld [vmem:[%s3130_s30 + $0x30] sm:$0xff] }
 0x11b   : > { %v782_v53 = vadd.f32 %v2338_v52, %v3089_v11  ;;  %2481 = vmatprep.subr.bf16.mxu1 %v2750_v49  ;;  %v823_v55 = vmax.f32 %v779_v51, 0.0  ;;  %v568_v51 = vld [vmem:[%s3130_s30 + $0x38] sm:$0xff]  ;;  %v569_v52 = vld [vmem:[%s3130_s30 + $0x40] sm:$0xff] }
 0x11d   : > { %v824_v56 = vmax.f32 %v782_v53, 0.0  ;;  %v2339_v57 = vpop.f32.mrb[16].mxu0  ;;  %v570_v53 = vld [vmem:[%s3130_s30 + $0x48] sm:$0xff] }
 0x11e   : > { %v2340_v58 = vpop.f32.mrb[17].mxu0  ;;  %2482 = vmatpush3.bf16.msra.mxu1 %v2750_v49  ;;  %v579_v49 = vpack.c.bf16 %v566_v48, %v565_v47 }
 0x11f   : > { %v2341_v59 = vadd.f32 %v2340_v58, %v2339_v57  ;;  %v2342_v60 = vpop.f32.mrb[18].mxu0  ;;  %v836_v61 = vpack.c.bf16 %v824_v56, %v823_v55  ;;  %2483 = vmatprep.subr.bf16.mxu1 %v2751_v54  ;;  %v581_v55 = vpack.c.bf16 %v570_v53, %v569_v52  ;;  %v571_v56 = vld [vmem:[%s3130_s30 + $0x50] sm:$0xff]  ;;  %v572_v57 = vld [vmem:[%s3130_s30 + $0x58] sm:$0xff]  ;;  %v573_v58 = vld [vmem:[%s3130_s30 + $0x60] sm:$0xff] }
 0x120   : > { %v2343_v63 = vpop.f32.mrb[19].mxu0 }
 0x121   : > { %v787_v0 = vadd.f32 %v2341_v59, %v3089_v11  ;;  %v2344_v1 = vadd.f32 %v2343_v63, %v2342_v60  ;;  %2464 = vmatmul.mubr.bf16.gmra.mrb[4].mxu1 %v836_v61  ;;  %v574_v59 = vld [vmem:[%s3130_s30 + $0x68] sm:$0xff]  ;;  %v582_v60 = vpack.c.bf16 %v572_v57, %v571_v56  ;;  %v576_v63 = vld [vmem:[%s3130_s30 + $0x78] sm:$0xff] }
 0x122   : > { %2484 = vmatpush3.bf16.msra.mxu1 %v2751_v54  ;;  %v580_v54 = vpack.c.bf16 %v568_v51, %v567_v50  ;;  %v583_v61 = vpack.c.bf16 %v574_v59, %v573_v58 }
 0x123   : > { %v790_v2 = vadd.f32 %v2344_v1, %v3089_v11  ;;  %2485 = vmatprep.subr.bf16.mxu1 %v2752_v62  ;;  %v825_v4 = vmax.f32 %v787_v0, 0.0  ;;  %v2755_v1 = vld [vmem:[%s3465_s9] sm:$0xff]  }
 0x124   : > { %2507 = vmatprep.subr.bf16.mxu0 %v2755_v1 }
 0x125   : > { %v826_v5 = vmax.f32 %v790_v2, 0.0  ;;  %v2345_v6 = vpop.f32.mrb[20].mxu0  ;;  %v2756_v2 = vld [vmem:[%s3465_s9 + $0x8] sm:$0xff]   ;;  %2508 = vmatpush3.bf16.msra.mxu0 %v2755_v1 }
 0x126   : > { %v2346_v7 = vpop.f32.mrb[21].mxu0  ;;  %2486 = vmatpush3.bf16.msra.mxu1 %v2752_v62  ;;  %v575_v62 = vld [vmem:[%s3130_s30 + $0x70] sm:$0xff]  ;;  %2509 = vmatprep.subr.bf16.mxu0 %v2756_v2  ;;  %s2249_s30 = sshll.u32 (%p2962_p4), %s2950_s28, 6 }
 0x127   : > { %v2347_v8 = vadd.f32 %v2346_v7, %v2345_v6  ;;  %v2348_v9 = vpop.f32.mrb[22].mxu0  ;;  %v837_v10 = vpack.c.bf16 %v826_v5, %v825_v4  ;;  %2487 = vmatprep.subr.bf16.mxu1 %v2753_v3  ;;  %v584_v0 = vpack.c.bf16 %v576_v63, %v575_v62  ;;  %v2758_v4 = vld [vmem:[%s3465_s9 + $0x18] sm:$0xff]   ;;  %v2759_v5 = vld [vmem:[%s3465_s9 + $0x20] sm:$0xff]   ;;  %v2760_v6 = vld [vmem:[%s3465_s9 + $0x28] sm:$0xff]   ;;  %s3360_s20 = scalar_lea.vmem (%p2962_p4), %s3469_s13, %s2249_s30  }
 0x128   : > { %v2349_v13 = vpop.f32.mrb[23].mxu0  ;;  %v2761_v7 = vld [vmem:[%s3465_s9 + $0x30] sm:$0xff]  }
 0x129   : > { %v795_v14 = vadd.f32 %v2347_v8, %v3089_v11  ;;  %v2350_v15 = vadd.f32 %v2349_v13, %v2348_v9  ;;  %2467 = vmatprep.mubr.bf16.mxu1 %v837_v10  ;;  %2510 = vmatpush3.bf16.msra.mxu0 %v2756_v2  ;;  %v2762_v8 = vld [vmem:[%s3465_s9 + $0x38] sm:$0xff]   ;;  %v3177_v9 = vld [vmem:[%s3462_s6] sm:$0xff]   ;;  %v2773_v13 = vld [vmem:[%s3467_s11 + $0x10] sm:$0xff]  }
 0x12a   : > { %2488 = vmatpush3.bf16.msra.mxu1 %v2753_v3  ;;  %v2757_v3 = vld [vmem:[%s3465_s9 + $0x10] sm:$0xff]   ;;  %v2771_v10 = vld [vmem:[%s3467_s11] sm:$0xff]  }
 0x12b   : > { %v798_v16 = vadd.f32 %v2350_v15, %v3089_v11  ;;  %2489 = vmatprep.subr.bf16.mxu1 %v2754_v12  ;;  %v827_v17 = vmax.f32 %v795_v14, 0.0  ;;  %2511 = vmatprep.subr.bf16.mxu0 %v2757_v3  ;;  %v2774_v14 = vld [vmem:[%s3467_s11 + $0x18] sm:$0xff]   ;;  %v2775_v15 = vld [vmem:[%s3467_s11 + $0x20] sm:$0xff]  }
 0x12d   : > { %v828_v18 = vmax.f32 %v798_v16, 0.0  ;;  %v2351_v19 = vpop.f32.mrb[24].mxu0  ;;  %2512 = vmatpush3.bf16.msra.mxu0 %v2757_v3  ;;  %v2776_v16 = vld [vmem:[%s3467_s11 + $0x28] sm:$0xff]  }
 0x12e   : > { %v2352_v20 = vpop.f32.mrb[25].mxu0  ;;  %2490 = vmatpush3.bf16.msra.mxu1 %v2754_v12  ;;  %2513 = vmatprep.subr.bf16.mxu0 %v2758_v4  ;;  %v2772_v12 = vld [vmem:[%s3467_s11 + $0x8] sm:$0xff]  }
 0x12f   : > { %v2353_v21 = vadd.f32 %v2352_v20, %v2351_v19  ;;  %v2354_v22 = vpop.f32.mrb[26].mxu0  ;;  %v838_v23 = vpack.c.bf16 %v828_v18, %v827_v17  ;;  %2539 = vmatprep.subr.bf16.mxu1 %v2771_v10  ;;  %v2155_v17 = vld [vmem:[%s3461_s5] ss:$0 sm:$0xff] }
 0x130   : > { %v2355_v24 = vpop.f32.mrb[27].mxu0 }
 0x131   : > { %v803_v25 = vadd.f32 %v2353_v21, %v3089_v11  ;;  %v2356_v26 = vadd.f32 %v2355_v24, %v2354_v22  ;;  %2468 = vmatmul.mubr.bf16.gmra.mrb[8].mxu1 %v838_v23  ;;  %2514 = vmatpush3.bf16.msra.mxu0 %v2758_v4 }
 0x132   : > { %2515 = vmatprep.subr.bf16.mxu0 %v2759_v5 }
 0x133   : > { %v806_v27 = vadd.f32 %v2356_v26, %v3089_v11  ;;  %v829_v28 = vmax.f32 %v803_v25, 0.0 }
 0x135   : > { %v830_v29 = vmax.f32 %v806_v27, 0.0  ;;  %v2357_v30 = vpop.f32.mrb[28].mxu0  ;;  %2516 = vmatpush3.bf16.msra.mxu0 %v2759_v5 }
 0x136   : > { %v2358_v31 = vpop.f32.mrb[29].mxu0  ;;  %2517 = vmatprep.subr.bf16.mxu0 %v2760_v6 }
 0x137   : > { %v2359_v32 = vadd.f32 %v2358_v31, %v2357_v30  ;;  %v2360_v33 = vpop.f32.mrb[30].mxu0  ;;  %v839_v34 = vpack.c.bf16 %v830_v29, %v829_v28 }
 0x138   : > { %v2361_v35 = vpop.f32.mrb[31].mxu0 }
 0x139   : > { %v811_v36 = vadd.f32 %v2359_v32, %v3089_v11  ;;  %v2362_v37 = vadd.f32 %v2361_v35, %v2360_v33  ;;  %2471 = vmatprep.mubr.bf16.mxu1 %v839_v34  ;;  %2518 = vmatpush3.bf16.msra.mxu0 %v2760_v6 }
 0x13a   : > { %2519 = vmatprep.subr.bf16.mxu0 %v2761_v7 }
 0x13b   : > { %v814_v38 = vadd.f32 %v2362_v37, %v3089_v11  ;;  %v831_v41 = vmax.f32 %v811_v36, 0.0  ;;  %v578_v11 = vpack.c.bf16 %v564_v46, %v563_v45 }
 0x13d   : > { %v832_v42 = vmax.f32 %v814_v38, 0.0  ;;  %2520 = vmatpush3.bf16.msra.mxu0 %v2761_v7  ;;  %v3216_v7 = vld [vmem:[%s3464_s8] ss:$0 sm:$0xff] }
 0x13e   : > { %2521 = vmatprep.subr.bf16.mxu0 %v2762_v8 }
 0x13f   : > { %v840_v44 = vpack.c.bf16 %v832_v42, %v831_v41 }
 0x141   : > { %2472 = vmatmul.mubr.bf16.gmra.mrb[12].mxu1 %v840_v44  ;;  %2522 = vmatpush3.bf16.msra.mxu0 %v2762_v8 }
 0x142   : > { %2491 = vmatprep.mubr.bf16.mxu1 %v577_v43  ;;  %2571 = vmatprep.subr.bf16.mxu0 %v3177_v9 }
 0x149   : > { %2492 = vmatmul.mubr.bf16.vlgmr.msra.gmra.mrb[16].mxu1 %v578_v11 }
 0x14a   : > { %2495 = vmatprep.mubr.bf16.mxu1 %v579_v49  ;;  %2540 = vmatpush3.bf16.msra.mxu1 %v2771_v10 }
 0x14b   : > { %2541 = vmatprep.subr.bf16.mxu1 %v2772_v12 }
 0x14e   : > { %2542 = vmatpush3.bf16.msra.mxu1 %v2772_v12 }
 0x14f   : > { %2543 = vmatprep.subr.bf16.mxu1 %v2773_v13 }
 0x151   : > { %2496 = vmatmul.mubr.bf16.gmra.mrb[20].mxu1 %v580_v54 }
 0x152   : > { %2499 = vmatprep.mubr.bf16.mxu1 %v581_v55  ;;  %2544 = vmatpush3.bf16.msra.mxu1 %v2773_v13 }
 0x153   : > { %2545 = vmatprep.subr.bf16.mxu1 %v2774_v14 }
 0x156   : > { %2546 = vmatpush3.bf16.msra.mxu1 %v2774_v14 }
 0x157   : > { %2547 = vmatprep.subr.bf16.mxu1 %v2775_v15 }
 0x159   : > { %2500 = vmatmul.mubr.bf16.gmra.mrb[24].mxu1 %v582_v60 }
 0x15a   : > { %2503 = vmatprep.mubr.bf16.mxu1 %v583_v61  ;;  %2548 = vmatpush3.bf16.msra.mxu1 %v2775_v15 }
 0x15b   : > { %2549 = vmatprep.subr.bf16.mxu1 %v2776_v16 }
 0x15e   : > { %2550 = vmatpush3.bf16.msra.mxu1 %v2776_v16 }
 0x161   : > { %2504 = vmatmul.mubr.bf16.gmra.mrb[28].mxu1 %v584_v0 }
 0x1e4   : > { %v2461_v18 = vpop.f32.mrb[0].mxu1 }
 0x1e5   : > { %v955_v19 = vadd.f32 %v2461_v18, %v2155_v17  ;;  %v946_v20 = vpop.f32.mrb[1].mxu1 }
 0x1e6   : > { %v947_v21 = vadd.f32 %v2155_v17, %v946_v20  ;;  %v2462_v22 = vpop.f32.mrb[2].mxu1 }
 0x1e7   : > { %v958_v23 = vadd.f32 %v2462_v22, %v2155_v17  ;;  %v949_v24 = vpop.f32.mrb[3].mxu1  ;;  %v1011_v26 = vmax.f32 %v955_v19, 0.0 }
 0x1e8   : > { %v950_v25 = vadd.f32 %v2155_v17, %v949_v24  ;;  %v1009_v28 = vmax.f32 %v947_v21, 0.0 }
 0x1e9   : > { %v1012_v27 = vmax.f32 %v958_v23, 0.0 }
 0x1ea   : > { %v1010_v29 = vmax.f32 %v950_v25, 0.0 }
 0x1eb   : > { %v3201_v30 = vpack.c.bf16 %v1012_v27, %v1011_v26 }
 0x1ec   : > { %v3203_v31 = vpack.c.bf16 %v1010_v29, %v1009_v28  ;;  %v3230_v29 = vld [vmem:[%s3462_s6 + $0x8] sm:$0xff]  }
 0x1f4   : > { %v2465_v32 = vpop.f32.mrb[4].mxu1 }
 0x1f5   : > { %v971_v33 = vadd.f32 %v2465_v32, %v2155_v17  ;;  %v962_v34 = vpop.f32.mrb[5].mxu1 }
 0x1f6   : > { %v963_v35 = vadd.f32 %v2155_v17, %v962_v34  ;;  %v2466_v36 = vpop.f32.mrb[6].mxu1 }
 0x1f7   : > { %v974_v37 = vadd.f32 %v2466_v36, %v2155_v17  ;;  %v965_v38 = vpop.f32.mrb[7].mxu1  ;;  %v1015_v40 = vmax.f32 %v971_v33, 0.0 }
 0x1f8   : > { %v966_v39 = vadd.f32 %v2155_v17, %v965_v38  ;;  %v1013_v42 = vmax.f32 %v963_v35, 0.0 }
 0x1f9   : > { %v1016_v41 = vmax.f32 %v974_v37, 0.0 }
 0x1fa   : > { %v1014_v43 = vmax.f32 %v966_v39, 0.0  ;;  %v3240_v39 = vld [vmem:[%s3462_s6 + $0x10] sm:$0xff]  }
 0x1fb   : > { %v3205_v44 = vpack.c.bf16 %v1016_v41, %v1015_v40 }
 0x1fc   : > { %v3207_v45 = vpack.c.bf16 %v1014_v43, %v1013_v42 }
 0x204   : > { %v2469_v46 = vpop.f32.mrb[8].mxu1 }
 0x205   : > { %v987_v47 = vadd.f32 %v2469_v46, %v2155_v17  ;;  %v978_v48 = vpop.f32.mrb[9].mxu1 }
 0x206   : > { %v979_v11 = vadd.f32 %v2155_v17, %v978_v48  ;;  %v2470_v49 = vpop.f32.mrb[10].mxu1 }
 0x207   : > { %v990_v50 = vadd.f32 %v2470_v49, %v2155_v17  ;;  %v981_v51 = vpop.f32.mrb[11].mxu1  ;;  %v1019_v53 = vmax.f32 %v987_v47, 0.0 }
 0x208   : > { %v982_v52 = vadd.f32 %v2155_v17, %v981_v51  ;;  %v1017_v55 = vmax.f32 %v979_v11, 0.0  ;;  %v3248_v11 = vld [vmem:[%s3462_s6 + $0x18] sm:$0xff]  }
 0x209   : > { %v1020_v54 = vmax.f32 %v990_v50, 0.0 }
 0x20a   : > { %v1018_v56 = vmax.f32 %v982_v52, 0.0 }
 0x20b   : > { %v3209_v57 = vpack.c.bf16 %v1020_v54, %v1019_v53 }
 0x20c   : > { %v3211_v58 = vpack.c.bf16 %v1018_v56, %v1017_v55  ;;  %v3258_v56 = vld [vmem:[%s3462_s6 + $0x20] sm:$0xff]  }
 0x214   : > { %v2473_v59 = vpop.f32.mrb[12].mxu1 }
 0x215   : > { %v1003_v60 = vadd.f32 %v2473_v59, %v2155_v17  ;;  %v994_v61 = vpop.f32.mrb[13].mxu1 }
 0x216   : > { %v995_v62 = vadd.f32 %v2155_v17, %v994_v61  ;;  %v2474_v63 = vpop.f32.mrb[14].mxu1 }
 0x217   : > { %v1006_v0 = vadd.f32 %v2474_v63, %v2155_v17  ;;  %v997_v1 = vpop.f32.mrb[15].mxu1  ;;  %v1023_v3 = vmax.f32 %v1003_v60, 0.0 }
 0x218   : > { %v998_v2 = vadd.f32 %v2155_v17, %v997_v1  ;;  %v1021_v5 = vmax.f32 %v995_v62, 0.0 }
 0x219   : > { %v1024_v4 = vmax.f32 %v1006_v0, 0.0 }
 0x21a   : > { %v1022_v6 = vmax.f32 %v998_v2, 0.0  ;;  %v3266_v2 = vld [vmem:[%s3462_s6 + $0x28] sm:$0xff]  }
 0x21b   : > { %v3218_v8 = vpack.c.bf16 %v1024_v4, %v1023_v3 }
 0x21c   : > { %v3220_v10 = vpack.c.bf16 %v1022_v6, %v1021_v5  ;;  %v2493_v12 = vpop.f32.mrb[16].mxu1 }
 0x21d   : > { %v1163_v13 = vadd.f32 %v2493_v12, %v3216_v7  ;;  %v1154_v14 = vpop.f32.mrb[17].mxu1 }
 0x21e   : > { %v1155_v15 = vadd.f32 %v3216_v7, %v1154_v14  ;;  %v2494_v16 = vpop.f32.mrb[18].mxu1 }
 0x21f   : > { %v1166_v17 = vadd.f32 %v2494_v16, %v3216_v7  ;;  %v1157_v18 = vpop.f32.mrb[19].mxu1  ;;  %v1219_v20 = vmax.f32 %v1163_v13, 0.0 }
 0x220   : > { %v1158_v19 = vadd.f32 %v3216_v7, %v1157_v18  ;;  %v1217_v22 = vmax.f32 %v1155_v15, 0.0  ;;  %v3276_v15 = vld [vmem:[%s3462_s6 + $0x30] sm:$0xff]  }
 0x221   : > { %v1220_v21 = vmax.f32 %v1166_v17, 0.0 }
 0x222   : > { %v1218_v23 = vmax.f32 %v1158_v19, 0.0 }
 0x223   : > { %v1234_v24 = vpack.c.bf16 %v1220_v21, %v1219_v20  ;;  %v2777_v20 = vld [vmem:[%s3467_s11 + $0x30] sm:$0xff]  }
 0x224   : > { %v1233_v25 = vpack.c.bf16 %v1218_v23, %v1217_v22  ;;  %v2497_v26 = vpop.f32.mrb[20].mxu1  ;;  %2551 = vmatprep.subr.bf16.mxu1 %v2777_v20 }
 0x225   : > { %v1179_v27 = vadd.f32 %v2497_v26, %v3216_v7  ;;  %v1170_v28 = vpop.f32.mrb[21].mxu1  ;;  %2552 = vmatpush3.bf16.msra.mxu1 %v2777_v20 }
 0x226   : > { %v1171_v32 = vadd.f32 %v3216_v7, %v1170_v28  ;;  %v2498_v33 = vpop.f32.mrb[22].mxu1  ;;  %2523 = vmatprep.mubr.bf16.mxu0 %v1233_v25 }
 0x227   : > { %v1182_v34 = vadd.f32 %v2498_v33, %v3216_v7  ;;  %v1173_v35 = vpop.f32.mrb[23].mxu1  ;;  %2524 = vmatmul.mubr.bf16.vlgmr.msra.gmra.mrb[32].mxu0 %v1234_v24  ;;  %v1223_v37 = vmax.f32 %v1179_v27, 0.0 }
 0x228   : > { %v1174_v36 = vadd.f32 %v3216_v7, %v1173_v35  ;;  %2572 = vmatpush3.bf16.msra.mxu0 %v3177_v9  ;;  %v1221_v40 = vmax.f32 %v1171_v32, 0.0 }
 0x229   : > { %v1224_v38 = vmax.f32 %v1182_v34, 0.0  ;;  %2573 = vmatprep.subr.bf16.mxu0 %v3230_v29 }
 0x22a   : > { %v1222_v41 = vmax.f32 %v1174_v36, 0.0 }
 0x22b   : > { %v1236_v42 = vpack.c.bf16 %v1224_v38, %v1223_v37 }
 0x22c   : > { %v1235_v43 = vpack.c.bf16 %v1222_v41, %v1221_v40  ;;  %v2501_v46 = vpop.f32.mrb[24].mxu1  ;;  %2574 = vmatpush3.bf16.msra.mxu0 %v3230_v29 }
 0x22d   : > { %v1195_v47 = vadd.f32 %v2501_v46, %v3216_v7  ;;  %v1186_v48 = vpop.f32.mrb[25].mxu1  ;;  %2575 = vmatprep.subr.bf16.mxu0 %v3240_v39 }
 0x22e   : > { %v1187_v49 = vadd.f32 %v3216_v7, %v1186_v48  ;;  %v2502_v50 = vpop.f32.mrb[26].mxu1  ;;  %2527 = vmatprep.mubr.bf16.mxu0 %v1235_v43 }
 0x22f   : > { %v1198_v51 = vadd.f32 %v2502_v50, %v3216_v7  ;;  %v1189_v52 = vpop.f32.mrb[27].mxu1  ;;  %2528 = vmatmul.mubr.bf16.gmra.mrb[36].mxu0 %v1236_v42  ;;  %v1227_v54 = vmax.f32 %v1195_v47, 0.0 }
 0x230   : > { %v1190_v53 = vadd.f32 %v3216_v7, %v1189_v52  ;;  %2576 = vmatpush3.bf16.msra.mxu0 %v3240_v39  ;;  %v1225_v59 = vmax.f32 %v1187_v49, 0.0 }
 0x231   : > { %v1228_v55 = vmax.f32 %v1198_v51, 0.0  ;;  %2577 = vmatprep.subr.bf16.mxu0 %v3248_v11 }
 0x232   : > { %v1226_v60 = vmax.f32 %v1190_v53, 0.0 }
 0x233   : > { %v1238_v61 = vpack.c.bf16 %v1228_v55, %v1227_v54 }
 0x234   : > { %v1237_v62 = vpack.c.bf16 %v1226_v60, %v1225_v59  ;;  %v2505_v63 = vpop.f32.mrb[28].mxu1  ;;  %2578 = vmatpush3.bf16.msra.mxu0 %v3248_v11 }
 0x235   : > { %v1211_v0 = vadd.f32 %v2505_v63, %v3216_v7  ;;  %v1202_v1 = vpop.f32.mrb[29].mxu1  ;;  %2579 = vmatprep.subr.bf16.mxu0 %v3258_v56 }
 0x236   : > { %v1203_v3 = vadd.f32 %v3216_v7, %v1202_v1  ;;  %v2506_v4 = vpop.f32.mrb[30].mxu1  ;;  %2531 = vmatprep.mubr.bf16.mxu0 %v1237_v62 }
 0x237   : > { %v1214_v5 = vadd.f32 %v2506_v4, %v3216_v7  ;;  %v1205_v6 = vpop.f32.mrb[31].mxu1  ;;  %2532 = vmatmul.mubr.bf16.gmra.mrb[40].mxu0 %v1238_v61  ;;  %v1231_v13 = vmax.f32 %v1211_v0, 0.0 }
 0x238   : > { %v1206_v12 = vadd.f32 %v3216_v7, %v1205_v6  ;;  %2580 = vmatpush3.bf16.msra.mxu0 %v3258_v56  ;;  %v1229_v16 = vmax.f32 %v1203_v3, 0.0  ;;  %v3283_v7 = vld [vmem:[%s3462_s6 + $0x38] sm:$0xff]  }
 0x239   : > { %v1232_v14 = vmax.f32 %v1214_v5, 0.0  ;;  %2581 = vmatprep.subr.bf16.mxu0 %v3266_v2 }
 0x23a   : > { %v1230_v17 = vmax.f32 %v1206_v12, 0.0 }
 0x23b   : > { %v1240_v18 = vpack.c.bf16 %v1232_v14, %v1231_v13 }
 0x23c   : > { %v1239_v19 = vpack.c.bf16 %v1230_v17, %v1229_v16  ;;  %2582 = vmatpush3.bf16.msra.mxu0 %v3266_v2 }
 0x23d   : > { %2583 = vmatprep.subr.bf16.mxu0 %v3276_v15 }
 0x23e   : > { %2535 = vmatprep.mubr.bf16.mxu0 %v1239_v19 }
 0x23f   : > { %2536 = vmatmul.mubr.bf16.gmra.mrb[44].mxu0 %v1240_v18 }
 0x240   : > { %2584 = vmatpush3.bf16.msra.mxu0 %v3276_v15  ;;  %2587 = vmatprep.mubr.bf16.mxu0 %v3203_v31  ;;  %v2778_v31 = vld [vmem:[%s3467_s11 + $0x38] sm:$0xff]  }
 0x241   : > { %2585 = vmatprep.subr.bf16.mxu0 %v3283_v7  ;;  %2553 = vmatprep.subr.bf16.mxu1 %v2778_v31 }
 0x242   : > { %2554 = vmatpush3.bf16.msra.mxu1 %v2778_v31 }
 0x243   : > { %2603 = vmatprep.subr.bf16.mxu1 %v3177_v9 }
 0x244   : > { %2586 = vmatpush3.bf16.msra.mxu0 %v3283_v7 }
 0x247   : > { %2588 = vmatmul.mubr.bf16.vlgmr.msra.gmra.mrb[48].mxu0 %v3201_v30  ;;  %v3302_v30 = vld [vmem:[%s3466_s10] ss:$0 sm:$0xff] }
 0x248   : > { %2591 = vmatprep.mubr.bf16.mxu0 %v3207_v45 }
 0x24f   : > { %2592 = vmatmul.mubr.bf16.gmra.mrb[52].mxu0 %v3205_v44 }
 0x2fa   : > { %v2525_v44 = vpop.f32.mrb[32].mxu0 }
 0x2fb   : > { %v1355_v45 = vadd.f32 %v2525_v44, %v3302_v30  ;;  %v1346_v21 = vpop.f32.mrb[33].mxu0 }
 0x2fc   : > { %v1347_v22 = vadd.f32 %v3302_v30, %v1346_v21  ;;  %v2526_v23 = vpop.f32.mrb[34].mxu0 }
 0x2fd   : > { %v1358_v24 = vadd.f32 %v2526_v23, %v3302_v30  ;;  %v1349_v25 = vpop.f32.mrb[35].mxu0  ;;  %v1411_v27 = vmax.f32 %v1355_v45, 0.0 }
 0x2fe   : > { %v1350_v26 = vadd.f32 %v3302_v30, %v1349_v25  ;;  %v1409_v32 = vmax.f32 %v1347_v22, 0.0 }
 0x2ff   : > { %v1412_v28 = vmax.f32 %v1358_v24, 0.0 }
 0x300   : > { %v1410_v33 = vmax.f32 %v1350_v26, 0.0 }
 0x301   : > { %v1426_v34 = vpack.c.bf16 %v1412_v28, %v1411_v27 }
 0x302   : > { %v1425_v35 = vpack.c.bf16 %v1410_v33, %v1409_v32  ;;  %v2529_v36 = vpop.f32.mrb[36].mxu0 }
 0x303   : > { %v1371_v37 = vadd.f32 %v2529_v36, %v3302_v30  ;;  %v1362_v38 = vpop.f32.mrb[37].mxu0 }
 0x304   : > { %v1363_v40 = vadd.f32 %v3302_v30, %v1362_v38  ;;  %v2530_v41 = vpop.f32.mrb[38].mxu0  ;;  %2555 = vmatprep.mubr.bf16.mxu1 %v1425_v35 }
 0x305   : > { %v1374_v42 = vadd.f32 %v2530_v41, %v3302_v30  ;;  %v1365_v43 = vpop.f32.mrb[39].mxu0  ;;  %2556 = vmatmul.mubr.bf16.vlgmr.msra.gmra.mrb[32].mxu1 %v1426_v34  ;;  %v1415_v47 = vmax.f32 %v1371_v37, 0.0 }
 0x306   : > { %v1366_v46 = vadd.f32 %v3302_v30, %v1365_v43  ;;  %2611 = vmatpush3.bf16.msra.mxu1 %v3177_v9  ;;  %v1413_v49 = vmax.f32 %v1363_v40, 0.0 }
 0x307   : > { %v1416_v48 = vmax.f32 %v1374_v42, 0.0  ;;  %2604 = vmatprep.subr.bf16.mxu1 %v3230_v29 }
 0x308   : > { %v1414_v50 = vmax.f32 %v1366_v46, 0.0 }
 0x309   : > { %v1428_v51 = vpack.c.bf16 %v1416_v48, %v1415_v47 }
 0x30a   : > { %v1427_v52 = vpack.c.bf16 %v1414_v50, %v1413_v49  ;;  %2612 = vmatpush3.bf16.msra.mxu1 %v3230_v29  ;;  %v2533_v53 = vpop.f32.mrb[40].mxu0 }
 0x30b   : > { %v1387_v54 = vadd.f32 %v2533_v53, %v3302_v30  ;;  %v1378_v55 = vpop.f32.mrb[41].mxu0  ;;  %2605 = vmatprep.subr.bf16.mxu1 %v3240_v39 }
 0x30c   : > { %v1379_v59 = vadd.f32 %v3302_v30, %v1378_v55  ;;  %v2534_v60 = vpop.f32.mrb[42].mxu0  ;;  %2559 = vmatprep.mubr.bf16.mxu1 %v1427_v52 }
 0x30d   : > { %v1390_v9 = vadd.f32 %v2534_v60, %v3302_v30  ;;  %v1381_v61 = vpop.f32.mrb[43].mxu0  ;;  %2560 = vmatmul.mubr.bf16.gmra.mrb[36].mxu1 %v1428_v51  ;;  %v1419_v63 = vmax.f32 %v1387_v54, 0.0 }
 0x30e   : > { %v1382_v62 = vadd.f32 %v3302_v30, %v1381_v61  ;;  %2613 = vmatpush3.bf16.msra.mxu1 %v3240_v39  ;;  %v1417_v0 = vmax.f32 %v1379_v59, 0.0 }
 0x30f   : > { %v1420_v29 = vmax.f32 %v1390_v9, 0.0  ;;  %2606 = vmatprep.subr.bf16.mxu1 %v3248_v11 }
 0x310   : > { %v1418_v1 = vmax.f32 %v1382_v62, 0.0 }
 0x311   : > { %v1430_v3 = vpack.c.bf16 %v1420_v29, %v1419_v63 }
 0x312   : > { %v1429_v4 = vpack.c.bf16 %v1418_v1, %v1417_v0  ;;  %2614 = vmatpush3.bf16.msra.mxu1 %v3248_v11  ;;  %v2537_v5 = vpop.f32.mrb[44].mxu0 }
 0x313   : > { %v1403_v6 = vadd.f32 %v2537_v5, %v3302_v30  ;;  %v1394_v12 = vpop.f32.mrb[45].mxu0  ;;  %2607 = vmatprep.subr.bf16.mxu1 %v3258_v56 }
 0x314   : > { %v1395_v13 = vadd.f32 %v3302_v30, %v1394_v12  ;;  %v2538_v14 = vpop.f32.mrb[46].mxu0  ;;  %2563 = vmatprep.mubr.bf16.mxu1 %v1429_v4 }
 0x315   : > { %v1406_v39 = vadd.f32 %v2538_v14, %v3302_v30  ;;  %v1397_v16 = vpop.f32.mrb[47].mxu0  ;;  %2564 = vmatmul.mubr.bf16.gmra.mrb[40].mxu1 %v1430_v3  ;;  %v1423_v18 = vmax.f32 %v1403_v6, 0.0 }
 0x316   : > { %v1398_v17 = vadd.f32 %v3302_v30, %v1397_v16  ;;  %2615 = vmatpush3.bf16.msra.mxu1 %v3258_v56  ;;  %v1421_v19 = vmax.f32 %v1395_v13, 0.0 }
 0x317   : > { %v1424_v11 = vmax.f32 %v1406_v39, 0.0  ;;  %2608 = vmatprep.subr.bf16.mxu1 %v3266_v2 }
 0x318   : > { %v1422_v20 = vmax.f32 %v1398_v17, 0.0 }
 0x319   : > { %v1432_v31 = vpack.c.bf16 %v1424_v11, %v1423_v18 }
 0x31a   : > { %v1431_v44 = vpack.c.bf16 %v1422_v20, %v1421_v19  ;;  %2616 = vmatpush3.bf16.msra.mxu1 %v3266_v2  ;;  %v2589_v45 = vpop.f32.mrb[48].mxu0 }
 0x31b   : > { %v1676_v21 = vpop.f32.mrb[49].mxu0  ;;  %2609 = vmatprep.subr.bf16.mxu1 %v3276_v15 }
 0x31c   : > { %2567 = vmatprep.mubr.bf16.mxu1 %v1431_v44  ;;  %v2590_v22 = vpop.f32.mrb[50].mxu0 }
 0x31d   : > { %2568 = vmatmul.mubr.bf16.gmra.mrb[44].mxu1 %v1432_v31  ;;  %v1679_v30 = vpop.f32.mrb[51].mxu0 }
 0x31e   : > { %2617 = vmatpush3.bf16.msra.mxu1 %v3276_v15  ;;  %2595 = vmatprep.mubr.bf16.mxu1 %v3211_v58  ;;  %v2198_v58 = vld [vmem:[%s3468_s12] ss:$0 sm:$0xff] }
 0x31f   : > { %2610 = vmatprep.subr.bf16.mxu1 %v3283_v7 }
 0x322   : > { %2618 = vmatpush3.bf16.msra.mxu1 %v3283_v7  ;;  %v2593_v56 = vpop.f32.mrb[52].mxu0 }
 0x323   : > { %v1692_v23 = vpop.f32.mrb[53].mxu0 }
 0x324   : > { %v2594_v2 = vpop.f32.mrb[54].mxu0 }
 0x325   : > { %v1695_v24 = vpop.f32.mrb[55].mxu0  ;;  %2596 = vmatmul.mubr.bf16.vlgmr.msra.gmra.mrb[40].mxu1 %v3209_v57 }
 0x326   : > { %2599 = vmatprep.mubr.bf16.mxu1 %v3220_v10 }
 0x32d   : > { %2600 = vmatmul.mubr.bf16.gmra.mrb[44].mxu1 %v3218_v8 }
 0x3d8   : > { %v2557_v25 = vpop.f32.mrb[32].mxu1 }
 0x3d9   : > { %v1685_v26 = vadd.f32 %v2589_v45, %v2557_v25  ;;  %v1531_v15 = vpop.f32.mrb[33].mxu1 }
 0x3da   : > { %v1677_v27 = vadd.f32 %v1676_v21, %v1531_v15  ;;  %v2558_v7 = vpop.f32.mrb[34].mxu1 }
 0x3db   : > { %v1688_v28 = vadd.f32 %v2590_v22, %v2558_v7  ;;  %v1534_v32 = vpop.f32.mrb[35].mxu1  ;;  %v1748_v34 = vadd.f32 %v2198_v58, %v1685_v26 }
 0x3dc   : > { %v1680_v33 = vadd.f32 %v1679_v30, %v1534_v32  ;;  %v1746_v35 = vadd.f32 %v2198_v58, %v1677_v27 }
 0x3dd   : > { %v1749_v57 = vadd.f32 %v2198_v58, %v1688_v28 }
 0x3de   : > { %v1747_v10 = vadd.f32 %v2198_v58, %v1680_v33 }
 0x3df   : > { %v2260_v36 = vpack.c.bf16 %v1749_v57, %v1748_v34 }
 0x3e0   : > { %v2255_v8 = vpack.c.bf16 %v1747_v10, %v1746_v35  ;;  %v2561_v37 = vpop.f32.mrb[36].mxu1 }
 0x3e1   : > { %2292 = vst [vmem:[%s3343_s25 + $0x8] sm:$0xff] %v2260_v36   ;;  %v1701_v38 = vadd.f32 %v2593_v56, %v2561_v37  ;;  %v1547_v40 = vpop.f32.mrb[37].mxu1 }
 0x3e2   : > { %2256 = vst [vmem:[%s3343_s25] sm:$0xff] %v2255_v8   ;;  %v1693_v41 = vadd.f32 %v1692_v23, %v1547_v40  ;;  %v2562_v42 = vpop.f32.mrb[38].mxu1 }
 0x3e3   : > { %v1704_v43 = vadd.f32 %v2594_v2, %v2562_v42  ;;  %v1550_v46 = vpop.f32.mrb[39].mxu1  ;;  %v1752_v48 = vadd.f32 %v2198_v58, %v1701_v38 }
 0x3e4   : > { %v1696_v47 = vadd.f32 %v1695_v24, %v1550_v46  ;;  %v1750_v50 = vadd.f32 %v2198_v58, %v1693_v41 }
 0x3e5   : > { %v1753_v49 = vadd.f32 %v2198_v58, %v1704_v43 }
 0x3e6   : > { %v1751_v51 = vadd.f32 %v2198_v58, %v1696_v47 }
 0x3e7   : > { %v2270_v52 = vpack.c.bf16 %v1753_v49, %v1752_v48 }
 0x3e8   : > { %v2265_v53 = vpack.c.bf16 %v1751_v51, %v1750_v50 }
 0x3e9   : > { %2294 = vst [vmem:[%s3343_s25 + $0x18] sm:$0xff] %v2270_v52  }
 0x3ea   : > { %2293 = vst [vmem:[%s3343_s25 + $0x10] sm:$0xff] %v2265_v53  }
 0x3f8   : > { %v2597_v54 = vpop.f32.mrb[40].mxu1 }
 0x3f9   : > { %v1708_v55 = vpop.f32.mrb[41].mxu1  ;;  %v1756_v60 = vadd.f32 %v2597_v54, %v2198_v58 }
 0x3fa   : > { %v2598_v59 = vpop.f32.mrb[42].mxu1  ;;  %v1754_v62 = vadd.f32 %v2198_v58, %v1708_v55 }
 0x3fb   : > { %v1757_v9 = vadd.f32 %v2598_v59, %v2198_v58  ;;  %v1711_v61 = vpop.f32.mrb[43].mxu1 }
 0x3fc   : > { %v1755_v63 = vadd.f32 %v2198_v58, %v1711_v61 }
 0x3fd   : > { %v2280_v29 = vpack.c.bf16 %v1757_v9, %v1756_v60 }
 0x3fe   : > { %v2275_v0 = vpack.c.bf16 %v1755_v63, %v1754_v62 }
 0x3ff   : > { %2296 = vst [vmem:[%s3343_s25 + $0x28] sm:$0xff] %v2280_v29  }
 0x400   : > { %2295 = vst [vmem:[%s3343_s25 + $0x20] sm:$0xff] %v2275_v0   ;;  %v2601_v1 = vpop.f32.mrb[44].mxu1 }
 0x401   : > { %v1724_v3 = vpop.f32.mrb[45].mxu1  ;;  %v1760_v5 = vadd.f32 %v2601_v1, %v2198_v58 }
 0x402   : > { %v2602_v4 = vpop.f32.mrb[46].mxu1  ;;  %v1758_v13 = vadd.f32 %v2198_v58, %v1724_v3  ;;  %1848 = sbr.rel (!%p2962_p4) target bundleno = 1092 (0x444), region = 76 }
 0x403   : > { %v1761_v6 = vadd.f32 %v2602_v4, %v2198_v58  ;;  %v1727_v12 = vpop.f32.mrb[47].mxu1 }
 0x404   : > { %v1759_v14 = vadd.f32 %v2198_v58, %v1727_v12 }
 0x405   : > { %v2290_v39 = vpack.c.bf16 %v1761_v6, %v1760_v5 }
 0x406   : > { %v2285_v16 = vpack.c.bf16 %v1759_v14, %v1758_v13 }
 0x407   : > { %2298 = vst [vmem:[%s3343_s25 + $0x38] sm:$0xff] %v2290_v39  }
 0x408   : > { %2297 = vst [vmem:[%s3343_s25 + $0x30] sm:$0xff] %v2285_v16  }
 0x409   : > { %s3481_s27 = smov (!%p1851_p8, %s1850_s27), 16 }
 0x40a   : > { %s2217_s21 = sshll.u32 %s3481_s27, 6 }
 0x40b   : > { %p2220_p9 = scmp.eq.s32.totalorder %s2217_s21, 0 }
 0x40c   : > { %s3366_s22 = sshrl.u32 (!%p2220_p9), %s3481_s27, 4 }
 0x40d   : > { %1859 = sbr.rel (%p2220_p9) target bundleno = 1092 (0x444), region = 80  ;;  %p2221_p10 = scmp.le.s32.totalorder (!%p2220_p9), %s3366_s22, 0 }
 0x414   : > { %2078 = sbr.rel (%p2221_p10) target bundleno = 1071 (0x42f), region = 155  ;;  %s3474_s28 = smov (!%p2221_p10), %s3360_s20 }
 0x415   : > { %s3475_s16 = smov (!%p2221_p10), %s3343_s25  ;;  %s3375_s19 = smov (!%p2221_p10), 0  }
 0x416   : > { %s3377_s24 = smov (!%p2221_p10), 0  }
 0x41b LB: >> { %v1875_v17 = vld [vmem:[%s2841_s16] sm:$0xf]  ;;  %v1877_v18 = vld [vmem:[%s2841_s16 + $0x4] sm:$0xf]  ;;  %v1879_v11 = vld [vmem:[%s2841_s16 + $0x8] sm:$0xf]  ;;  %s2849_s24 = sphi %s3377_s24, %s1869_s24   ;;  %s2845_s19 = sphi %s3375_s19, %s3476_s19   ;;  %s2841_s16 = sphi %s3475_s16, %s1912_s16   ;;  %s2837_s28 = sphi %s3474_s28, %s1913_s28  }
 0x41c   : >> { %1876 = vst [vmem:[%s2837_s28] sm:$0xf] %v1875_v17  ;;  %1878 = vst [vmem:[%s2837_s28 + $0x4] sm:$0xf] %v1877_v18  ;;  %v1881_v19 = vld [vmem:[%s2841_s16 + $0xc] sm:$0xf]  ;;  %s1907_s26 = sadd.s32 1, %s2845_s19 }
 0x41d   : >> { %1880 = vst [vmem:[%s2837_s28 + $0x8] sm:$0xf] %v1879_v11  ;;  %v1883_v20 = vld [vmem:[%s2841_s16 + $0x10] sm:$0xf]  ;;  %v1885_v31 = vld [vmem:[%s2841_s16 + $0x14] sm:$0xf]  ;;  %p1908_p11 = scmp.ge.s32.totalorder %s1907_s26, %s3366_s22 }
 0x41e   : >> { %1882 = vst [vmem:[%s2837_s28 + $0xc] sm:$0xf] %v1881_v19  ;;  %1884 = vst [vmem:[%s2837_s28 + $0x10] sm:$0xf] %v1883_v20  ;;  %v1887_v44 = vld [vmem:[%s2841_s16 + $0x18] sm:$0xf] }
 0x41f   : >> { %1886 = vst [vmem:[%s2837_s28 + $0x14] sm:$0xf] %v1885_v31  ;;  %v1889_v45 = vld [vmem:[%s2841_s16 + $0x1c] sm:$0xf]  ;;  %v1891_v21 = vld [vmem:[%s2841_s16 + $0x20] sm:$0xf] }
 0x420   : >> { %1888 = vst [vmem:[%s2837_s28 + $0x18] sm:$0xf] %v1887_v44  ;;  %1890 = vst [vmem:[%s2837_s28 + $0x1c] sm:$0xf] %v1889_v45  ;;  %v1893_v22 = vld [vmem:[%s2841_s16 + $0x24] sm:$0xf] }
 0x421   : >> { %1892 = vst [vmem:[%s2837_s28 + $0x20] sm:$0xf] %v1891_v21  ;;  %v1895_v30 = vld [vmem:[%s2841_s16 + $0x28] sm:$0xf]  ;;  %v1897_v56 = vld [vmem:[%s2841_s16 + $0x2c] sm:$0xf] }
 0x422   : >> { %1894 = vst [vmem:[%s2837_s28 + $0x24] sm:$0xf] %v1893_v22  ;;  %1896 = vst [vmem:[%s2837_s28 + $0x28] sm:$0xf] %v1895_v30  ;;  %v1899_v23 = vld [vmem:[%s2841_s16 + $0x30] sm:$0xf] }
 0x423   : >> { %1898 = vst [vmem:[%s2837_s28 + $0x2c] sm:$0xf] %v1897_v56  ;;  %v1901_v2 = vld [vmem:[%s2841_s16 + $0x34] sm:$0xf]  ;;  %v1903_v24 = vld [vmem:[%s2841_s16 + $0x38] sm:$0xf] }
 0x424   : >> { %1900 = vst [vmem:[%s2837_s28 + $0x30] sm:$0xf] %v1899_v23  ;;  %1902 = vst [vmem:[%s2837_s28 + $0x34] sm:$0xf] %v1901_v2  ;;  %v1905_v25 = vld [vmem:[%s2841_s16 + $0x3c] sm:$0xf] }
 0x425   : >> { %1904 = vst [vmem:[%s2837_s28 + $0x38] sm:$0xf] %v1903_v24  ;;  %1906 = vst [vmem:[%s2837_s28 + $0x3c] sm:$0xf] %v1905_v25  ;;  %s3483_s26 = smov (%p1908_p11, %s1907_s26), 0  ;;  %s1869_s24 = sadd.s32 1, %s2849_s24  }
 0x426   : >> { %s2222_s15 = sshll.u32 %s3483_s26, 6  ;;  %p1868_p12 = scmp.ge.s32.totalorder %s1869_s24, %s3366_s22 }
 0x427   : >> { %s1912_s16 = scalar_lea.vmem %s3343_s25, %s2222_s15 [#allocation2]   ;;  %s1913_s28 = scalar_lea.vmem %s3360_s20, %s2222_s15  }
 0x428   : >> { %s3476_s19 = smov %s3483_s26  ;;  %1871 = sbr.rel (!%p1868_p12) target bundleno = 1051 (0x41b), region = 161 }
 0x42f PF: > { %s3438_s18 = sand.u32 15, %s3481_s27   ;;  %s2250_s23 = sshll.u32 %s3366_s22, 6 }
 0x430   : > { %s1918_s30 = scalar_lea.vmem %s3343_s25, %s2250_s23 [#allocation2]   ;;  %s1920_s17 = scalar_lea.vmem %s3360_s20, %s2250_s23  }
 0x431   : > { %p2227_p13 = scmp.le.s32.totalorder %s3438_s18, 0 }
 0x432   : > { %s2851_s14 = smov (!%p2227_p13), %s1920_s17   ;;  %s2855_s21 = smov (!%p2227_p13), %s1918_s30  }
 0x433   : > { %2092 = sbr.rel (%p2227_p13) target bundleno = 1092 (0x444), region = 166  ;;  %s2859_s15 = smov (!%p2227_p13), 0  }
 0x434   : > { %s2863_s26 = smov (!%p2227_p13), 0  }
 0x43a LB: >> { %v1930_v26 = vld [vmem:[%s2857_s21] sm:$0xf]  ;;  %s1932_s27 = sadd.s32 1, %s2861_s15  ;;  %s1924_s26 = sadd.s32 1, %s2865_s26   ;;  %s2865_s26 = sphi %s2863_s26, %s1924_s26   ;;  %s2861_s15 = sphi %s2859_s15, %s2860_s15   ;;  %s2857_s21 = sphi %s2855_s21, %s1937_s21   ;;  %s2853_s14 = sphi %s2851_s14, %s1938_s14  }
 0x43b   : >> { %1931 = vst [vmem:[%s2853_s14] sm:$0xf] %v1930_v26  ;;  %p1933_p0 = scmp.ge.s32.totalorder %s1932_s27, %s3438_s18  ;;  %p1923_p1 = scmp.ge.s32.totalorder %s1924_s26, %s3438_s18 }
 0x43d   : >> { %s3485_s27 = smov (%p1933_p0, %s1932_s27), 0  ;;  %1926 = sbr.rel (!%p1923_p1) target bundleno = 1082 (0x43a), region = 172 }
 0x43e   : >> { %s2228_s25 = sshll.u32 %s3485_s27, 2  ;;  %s2860_s15 = smov %s3485_s27  }
 0x43f   : >> { %s1937_s21 = scalar_lea.vmem %s1918_s30, %s2228_s25 [#allocation2]   ;;  %s1938_s14 = scalar_lea.vmem %s1920_s17, %s2228_s25  }
 0x444 PF: > { %s3477_s25 = sld [smem:[#allocation3_spill]]  ;;  %s3478_s26 = sld [smem:[#allocation4_spill]] }
 0x445   : > { %p20_p2 = scmp.ge.s32.totalorder %s2952_s29, 10   ;;  %s3479_s27 = smov %s2952_s29 }
 0x447   :  { %22 = sbr.rel (!%p20_p2) target bundleno = 2 (0x2), region = 183 }

</bundles_post_ra>
